<compile_context>
chip_gen: v5e
topology: v5e:2x2
jax: 0.10.0
libtpu: 0.0.40
codegen_flags: <defaults>
</compile_context>

<pallas_src>
import jax
import jax.numpy as jnp
from jax.experimental import pallas as pl
from jax.experimental.pallas import tpu as pltpu


def _round_up(v, m):
    return (v + m - 1) // m * m


def _make_kernel(seg_slices, c_in, use_mxu, dilation):
    """seg_slices: list of (padded_start, padded_width, kind) channel slices."""

    def kernel(x_ref, w_ref, b_ref, o_ref):
        x = x_ref[0]          # (C_in, tn)    compute dtype (bf16)
        w = w_ref[...]        # (C_pad, C_in) compute dtype (bf16)

        if use_mxu:
            # MXU matmul, f32 accumulation.
            y = jnp.dot(w, x, preferred_element_type=jnp.float32)
        else:
            # Tiny K: unrolled VPU broadcast-FMA chain (the MXU would run at
            # ~K/256 utilization and add result-FIFO latency).
            xf = x.astype(jnp.float32)
            wf = w.astype(jnp.float32)
            y = wf[:, 0:1] * xf[0:1, :]
            for k in range(1, c_in):
                y = y + wf[:, k:k + 1] * xf[k:k + 1, :]

        y = y + b_ref[...]    # (C_pad, 1) f32 bias, broadcast along lanes

        # Per-segment activations on static, 8-aligned sublane slices.
        parts = []
        for start, width, kind in seg_slices:
            seg = y[start:start + width, :]
            if kind == "cls":
                seg = jax.nn.sigmoid(seg)
            elif kind == "reg":
                if dilation != 1.0:
                    seg = seg * dilation
            elif kind == "spr":
                seg = jnp.clip(seg, -3.0, 5.0)
            else:  # "scl"
                seg = jnp.maximum(seg, 0.0)
            parts.append(seg)
        out = parts[0] if len(parts) == 1 else jnp.concatenate(parts, axis=0)
        o_ref[0] = out.astype(o_ref.dtype)

    return kernel


def _fused_heads(x_cm, w_pad, bias_pad, seg_slices, tn, *, use_mxu,
                 dilation=1.0, vmem_limit_bytes=None):
    """Channel-major fused 1x1-conv heads.

    x_cm:     (B, C_in, M_pad)  compute dtype (bf16), M_pad a multiple of tn
    w_pad:    (C_pad, C_in)     compute dtype (bf16)
    bias_pad: (C_pad, 1)        float32
    returns   (B, C_pad, M_pad) float32
    """
    B, C_in, M_pad = x_cm.shape
    C_pad = w_pad.shape[0]
    assert tn % 128 == 0 and M_pad % tn == 0

    kernel = _make_kernel(seg_slices, C_in, use_mxu, dilation)

    cp_kwargs = dict(dimension_semantics=("parallel", "parallel"))
    if vmem_limit_bytes is not None:
        cp_kwargs["vmem_limit_bytes"] = int(vmem_limit_bytes)

    return pl.pallas_call(
        kernel,
        out_shape=jax.ShapeDtypeStruct((B, C_pad, M_pad), jnp.float32),
        grid_spec=pltpu.PrefetchScalarGridSpec(
            num_scalar_prefetch=0,
            grid=(B, M_pad // tn),
            in_specs=[
                pl.BlockSpec((1, C_in, tn), lambda b, j: (b, 0, j)),
                pl.BlockSpec((C_pad, C_in), lambda b, j: (0, 0)),
                pl.BlockSpec((C_pad, 1), lambda b, j: (0, 0)),
            ],
            out_specs=pl.BlockSpec((1, C_pad, tn), lambda b, j: (b, 0, j)),
        ),
        compiler_params=pltpu.CompilerParams(**cp_kwargs),
    )(x_cm, w_pad, bias_pad)


class CompositeFieldPallas:
    """JAX/Pallas port of openpifpaf CompositeField (1x1 conv, quad=0)."""

    def __init__(self, n, in_features, n_confidences=1, n_vectors=0,
                 n_scales=0, quad=0, dropout_p=0.0, kernel_size=1, padding=0,
                 dilation=1, seed=0, compute_dtype=jnp.bfloat16,
                 tn_target=1024, vmem_budget_bytes=40 << 20):
        assert quad == 0, "quad>0 (PixelShuffle) not implemented"
        assert kernel_size == 1 and padding == 0 and dilation == 1
        assert dropout_p == 0.0, "only inference dropout (identity)"

        self.n = n
        self.in_features = in_features
        self.n_confidences = n_confidences
        self.n_vectors = n_vectors
        self.n_scales = n_scales
        self.dilation = 1.0                       # matches the torch module
        self.compute_dtype = compute_dtype
        self.tn_target = int(tn_target)
        self.vmem_budget = int(vmem_budget_bytes)

        of = n * 4 ** quad
        self.out_features = of

        # channel widths of the four fused segments, in forward-return order
        widths = [("cls", n_confidences * of),
                  ("reg", n_vectors * 2 * of),
                  ("spr", n_vectors * of),
                  ("scl", n_scales * of)]
        self.c_total = sum(w for _, w in widths)

        # pad each segment to a multiple of 8 channels so in-kernel activation
        # slices are sublane-aligned
        self.seg_slices = []      # (padded_start, padded_width, kind)
        self.pad_starts = {}      # kind -> padded channel offset
        poff = 0
        for kind, wdt in widths:
            self.pad_starts[kind] = poff
            if wdt > 0:
                pwdt = _round_up(wdt, 8)
                self.seg_slices.append((poff, pwdt, kind))
                poff += pwdt
        self.c_pad = max(poff, 8)

        # Deterministic parameter init.  PyTorch Conv2d weight (C_out,C_in,1,1)
        # is stored directly as the channel-major matmul form (C_out, C_in),
        # concatenated over all heads in the order class|reg|spread|scale.
        key = jax.random.PRNGKey(seed)
        kw, kb = jax.random.split(key)
        w = 0.1 * jax.random.normal(kw, (self.c_total, in_features),
                                    dtype=jnp.float32)
        b = 0.05 * jax.random.normal(kb, (self.c_total,), dtype=jnp.float32)
        self.w = w                # unpadded, f32 (reference / export)
        self.b = b

        w_pad = jnp.zeros((self.c_pad, in_features), jnp.float32)
        b_pad = jnp.zeros((self.c_pad, 1), jnp.float32)
        loff = 0
        for kind, wdt in widths:
            if wdt > 0:
                ps = self.pad_starts[kind]
                w_pad = w_pad.at[ps:ps + wdt].set(w[loff:loff + wdt])
                b_pad = b_pad.at[ps:ps + wdt, 0].set(b[loff:loff + wdt])
                loff += wdt
        self.w_pad = w_pad.astype(compute_dtype)   # streamed in bf16
        self.bias_pad = b_pad                       # f32 (added post-accum)

    def __call__(self, x):
        """x: NCHW float32 (B, in_features, H, W). Returns list of NCHW arrays."""
        B, C, H, W = x.shape
        assert C == self.in_features
        HW = H * W

        # NCHW -> channel-major (B, C_in, H*W); a pure reshape, NO transpose.
        x_cm = x.reshape(B, C, HW).astype(self.compute_dtype)

        # Spatial (lane) tile: as large as possible under the VMEM budget.
        xb = jnp.dtype(self.compute_dtype).itemsize
        per_col = 2 * (C * xb + self.c_pad * 4)        # dbl-buffered in + out
        tn_budget = max(128, (self.vmem_budget // per_col) // 128 * 128)
        tn = max(128, min(self.tn_target, _round_up(HW, 128), tn_budget))
        m_pad = _round_up(HW, tn)
        if m_pad != HW:
            x_cm = jnp.pad(x_cm, ((0, 0), (0, 0), (0, m_pad - HW)))

        footprint = (per_col * tn
                     + 2 * self.c_pad * C * xb
                     + 2 * self.c_pad * 128 * 4)
        vmem_limit = footprint + (8 << 20) if footprint > (12 << 20) else None

        y = _fused_heads(x_cm, self.w_pad, self.bias_pad, self.seg_slices, tn,
                         use_mxu=(C > 16), dilation=self.dilation,
                         vmem_limit_bytes=vmem_limit)

        # (B, C_pad, M_pad) -> NCHW; strip spatial padding.
        y = y[:, :, :HW].reshape(B, self.c_pad, H, W)

        of = self.out_features
        s = self.pad_starts
        outs = []
        for i in range(self.n_confidences):
            outs.append(y[:, s["cls"] + i * of: s["cls"] + (i + 1) * of])
        for i in range(self.n_vectors):
            reg = y[:, s["reg"] + i * 2 * of: s["reg"] + (i + 1) * 2 * of]
            outs.append(reg.reshape(B, of, 2, H, W))
        for i in range(self.n_vectors):
            outs.append(y[:, s["spr"] + i * of: s["spr"] + (i + 1) * of])
        for i in range(self.n_scales):
            outs.append(y[:, s["scl"] + i * of: s["scl"] + (i + 1) * of])
        return outs


def _reference(module, x):
    """Pure-JAX reference of the same forward (same bf16 input/weight cast)."""
    B, C, H, W = x.shape
    xf = x.reshape(B, C, H * W).astype(module.compute_dtype)
    w = module.w.astype(module.compute_dtype)
    y = jnp.einsum("oc,bcm->bom", w, xf,
                   preferred_element_type=jnp.float32)
    y = y + module.b[None, :, None]
    of = module.out_features
    b0 = module.n_confidences * of
    b1 = b0 + module.n_vectors * 2 * of
    b2 = b1 + module.n_vectors * of
    y = jnp.concatenate([
        jax.nn.sigmoid(y[:, :b0]),
        y[:, b0:b1] * module.dilation,
        jnp.clip(y[:, b1:b2], -3.0, 5.0),
        jnp.maximum(y[:, b2:], 0.0),
    ], axis=1)
    return y.reshape(B, module.c_total, H, W)


if __name__ == "__main__":
    B, C_in, H, W = 2, 4, 16, 16
    n = 5
    module = CompositeFieldPallas(n=n, in_features=C_in,
                                  n_confidences=1, n_vectors=1, n_scales=1,
                                  quad=0, seed=0)

    x = jax.random.normal(jax.random.PRNGKey(0), (B, C_in, H, W),
                          dtype=jnp.float32)

    outs = module(x)
    outs = jax.block_until_ready(outs)

    # Correctness check vs pure-JAX reference on the fused map.
    ref = _reference(module, x)
    fused = jnp.concatenate([
        outs[0],                              # classes  (B, n, H, W)
        outs[1].reshape(B, 2 * n, H, W),      # regs     (B, n, 2, H, W)
        outs[2],                              # spreads  (B, n, H, W)
        outs[3],                              # scales   (B, n, H, W)
    ], axis=1)
    assert fused.shape == ref.shape
    max_err = float(jnp.max(jnp.abs(fused - ref)))
    assert jnp.allclose(fused, ref, atol=1e-4, rtol=1e-4), max_err

    # Shape checks against PyTorch semantics.
    assert outs[0].shape == (B, n, H, W)
    assert outs[1].shape == (B, n, 2, H, W)
    assert outs[2].shape == (B, n, H, W)
    assert outs[3].shape == (B, n, H, W)

    print("KERNEL_OK")
</pallas_src>

<mosaic_0001>
module attributes {stable_mosaic.version = 11 : i64} {
  func.func @kernel(%arg0: i32, %arg1: i32, %arg2: memref<1x4x256xbf16, #tpu.memory_space<vmem>>, %arg3: memref<40x4xbf16, #tpu.memory_space<vmem>>, %arg4: memref<40x1xf32, #tpu.memory_space<vmem>>, %arg5: memref<1x40x256xf32, #tpu.memory_space<vmem>>) attributes {dimension_semantics = [#tpu.dimension_semantics<parallel>, #tpu.dimension_semantics<parallel>], iteration_bounds = array<i64: 2, 1>, scalar_prefetch = 0 : i64, scratch_operands = 0 : i64, tpu.core_type = #tpu.core_type<tc>, window_params = [{transform_indices = @transform_0, window_bounds = array<i64: 1, 4, 256>}, {pipeline_mode = #tpu.pipeline_mode<synchronous>, transform_indices = @transform_1, window_bounds = array<i64: 40, 4>}, {pipeline_mode = #tpu.pipeline_mode<synchronous>, transform_indices = @transform_2, window_bounds = array<i64: 40, 1>}, {transform_indices = @transform_3, window_bounds = array<i64: 1, 40, 256>}]} {
    %c0 = arith.constant 0 : index
    %c0_0 = arith.constant 0 : index
    %c0_1 = arith.constant 0 : index
    %0 = vector.load %arg2[%c0, %c0_0, %c0_1] : memref<1x4x256xbf16, #tpu.memory_space<vmem>>, vector<1x4x256xbf16>
    %1 = vector.shape_cast %0 : vector<1x4x256xbf16> to vector<4x256xbf16>
    %c0_2 = arith.constant 0 : index
    %c0_3 = arith.constant 0 : index
    %2 = vector.load %arg3[%c0_2, %c0_3] : memref<40x4xbf16, #tpu.memory_space<vmem>>, vector<40x4xbf16>
    %3 = arith.extf %1 : vector<4x256xbf16> to vector<4x256xf32>
    %4 = arith.extf %2 : vector<40x4xbf16> to vector<40x4xf32>
    %5 = vector.extract_strided_slice %4 {offsets = [0, 0], sizes = [40, 1], strides = [1, 1]} : vector<40x4xf32> to vector<40x1xf32>
    %6 = vector.extract_strided_slice %3 {offsets = [0, 0], sizes = [1, 256], strides = [1, 1]} : vector<4x256xf32> to vector<1x256xf32>
    %7 = vector.broadcast %5 : vector<40x1xf32> to vector<40x256xf32>
    %8 = vector.broadcast %6 : vector<1x256xf32> to vector<40x256xf32>
    %9 = arith.mulf %7, %8 : vector<40x256xf32>
    %10 = vector.extract_strided_slice %4 {offsets = [0, 1], sizes = [40, 1], strides = [1, 1]} : vector<40x4xf32> to vector<40x1xf32>
    %11 = vector.extract_strided_slice %3 {offsets = [1, 0], sizes = [1, 256], strides = [1, 1]} : vector<4x256xf32> to vector<1x256xf32>
    %12 = vector.broadcast %10 : vector<40x1xf32> to vector<40x256xf32>
    %13 = vector.broadcast %11 : vector<1x256xf32> to vector<40x256xf32>
    %14 = arith.mulf %12, %13 : vector<40x256xf32>
    %15 = arith.addf %9, %14 : vector<40x256xf32>
    %16 = vector.extract_strided_slice %4 {offsets = [0, 2], sizes = [40, 1], strides = [1, 1]} : vector<40x4xf32> to vector<40x1xf32>
    %17 = vector.extract_strided_slice %3 {offsets = [2, 0], sizes = [1, 256], strides = [1, 1]} : vector<4x256xf32> to vector<1x256xf32>
    %18 = vector.broadcast %16 : vector<40x1xf32> to vector<40x256xf32>
    %19 = vector.broadcast %17 : vector<1x256xf32> to vector<40x256xf32>
    %20 = arith.mulf %18, %19 : vector<40x256xf32>
    %21 = arith.addf %15, %20 : vector<40x256xf32>
    %22 = vector.extract_strided_slice %4 {offsets = [0, 3], sizes = [40, 1], strides = [1, 1]} : vector<40x4xf32> to vector<40x1xf32>
    %23 = vector.extract_strided_slice %3 {offsets = [3, 0], sizes = [1, 256], strides = [1, 1]} : vector<4x256xf32> to vector<1x256xf32>
    %24 = vector.broadcast %22 : vector<40x1xf32> to vector<40x256xf32>
    %25 = vector.broadcast %23 : vector<1x256xf32> to vector<40x256xf32>
    %26 = arith.mulf %24, %25 : vector<40x256xf32>
    %27 = arith.addf %21, %26 : vector<40x256xf32>
    %c0_4 = arith.constant 0 : index
    %c0_5 = arith.constant 0 : index
    %28 = vector.load %arg4[%c0_4, %c0_5] : memref<40x1xf32, #tpu.memory_space<vmem>>, vector<40x1xf32>
    %29 = vector.broadcast %28 : vector<40x1xf32> to vector<40x256xf32>
    %30 = arith.addf %27, %29 : vector<40x256xf32>
    %31 = vector.extract_strided_slice %30 {offsets = [0, 0], sizes = [8, 256], strides = [1, 1]} : vector<40x256xf32> to vector<8x256xf32>
    %32 = arith.negf %31 : vector<8x256xf32>
    %33 = math.exp %32 : vector<8x256xf32>
    %cst = arith.constant 1.000000e+00 : f32
    %34 = vector.broadcast %cst : f32 to vector<8x256xf32>
    %35 = arith.addf %34, %33 : vector<8x256xf32>
    %36 = arith.divf %34, %35 : vector<8x256xf32>
    %37 = vector.extract_strided_slice %30 {offsets = [8, 0], sizes = [16, 256], strides = [1, 1]} : vector<40x256xf32> to vector<16x256xf32>
    %38 = vector.extract_strided_slice %30 {offsets = [24, 0], sizes = [8, 256], strides = [1, 1]} : vector<40x256xf32> to vector<8x256xf32>
    %cst_6 = arith.constant -3.000000e+00 : f32
    %cst_7 = arith.constant 5.000000e+00 : f32
    %39 = vector.broadcast %cst_6 : f32 to vector<8x256xf32>
    %40 = arith.maximumf %39, %38 : vector<8x256xf32>
    %41 = vector.broadcast %cst_7 : f32 to vector<8x256xf32>
    %42 = arith.minimumf %41, %40 : vector<8x256xf32>
    %43 = vector.extract_strided_slice %30 {offsets = [32, 0], sizes = [8, 256], strides = [1, 1]} : vector<40x256xf32> to vector<8x256xf32>
    %cst_8 = arith.constant 0.000000e+00 : f32
    %44 = vector.broadcast %cst_8 : f32 to vector<8x256xf32>
    %45 = arith.maximumf %43, %44 : vector<8x256xf32>
    %46 = tpu.concatenate %36, %37, %42, %45 in 0 : vector<8x256xf32>, vector<16x256xf32>, vector<8x256xf32>, vector<8x256xf32> -> vector<40x256xf32>
    %c0_9 = arith.constant 0 : index
    %c0_10 = arith.constant 0 : index
    %c0_11 = arith.constant 0 : index
    %47 = vector.load %arg5[%c0_9, %c0_10, %c0_11] : memref<1x40x256xf32, #tpu.memory_space<vmem>>, vector<1x40x256xf32>
    %48 = vector.shape_cast %47 : vector<1x40x256xf32> to vector<40x256xf32>
    %49 = vector.shape_cast %46 : vector<40x256xf32> to vector<1x40x256xf32>
    tpu.vector_store %arg5[%c0_9, %c0_10, %c0_11], %49 {strides = array<i32>} : memref<1x40x256xf32, #tpu.memory_space<vmem>>, vector<1x40x256xf32>,
    return
  }
  func.func @transform_0(%arg0: i32, %arg1: i32) -> (i32, i32, i32) {
    %c0_i32 = arith.constant 0 : i32
    %c0_i32_0 = arith.constant 0 : i32
    return %arg0, %c0_i32, %arg1 : i32, i32, i32
  }
  func.func @transform_1(%arg0: i32, %arg1: i32) -> (i32, i32) {
    %c0_i32 = arith.constant 0 : i32
    %c0_i32_0 = arith.constant 0 : i32
    %c0_i32_1 = arith.constant 0 : i32
    return %c0_i32, %c0_i32_0 : i32, i32
  }
  func.func @transform_2(%arg0: i32, %arg1: i32) -> (i32, i32) {
    %c0_i32 = arith.constant 0 : i32
    %c0_i32_0 = arith.constant 0 : i32
    %c0_i32_1 = arith.constant 0 : i32
    return %c0_i32, %c0_i32_0 : i32, i32
  }
  func.func @transform_3(%arg0: i32, %arg1: i32) -> (i32, i32, i32) {
    %c0_i32 = arith.constant 0 : i32
    %c0_i32_0 = arith.constant 0 : i32
    return %arg0, %c0_i32, %arg1 : i32, i32, i32
  }
}

</mosaic_0001>

<bundles_post_ra>
// kernel: tpu_custom_call.1
= control target key start
LH: loop header
LB: loop body
LE: loop exit
PB: predicated region body
PF: predicated region fallthrough
CT: control target
= control target key end

     0   :  { %8 = vsyncpa [#allocation3], 0  ;;  %s1050_s0 = inlined_call_operand.vmem [shape: bf16[2,4,256], index: 0, kind: input, shape index: {}]   ;;  %s1051_s1 = inlined_call_operand.vmem [shape: bf16[40,4], index: 1, kind: input, shape index: {}]   ;;  %s1052_s2 = inlined_call_operand.vmem [shape: f32[40,1], index: 2, kind: input, shape index: {}]   ;;  %s1053_s3 = inlined_call_operand.hbm [shape: f32[2,40,256], index: 3, kind: output, shape index: {}]  }
   0x1   :  { %10 = vsyncpa [#allocation3 + $0x1], 0  ;;  %s836_s12 = smov 0   ;;  %s838_s13 = smov 0  }
   0x2   :  { %s840_s14 = smov 0   ;;  %s842_s15 = smov 0  }
   0x3   :  { %s844_s16 = smov 0   ;;  %s846_s17 = smov 0  }
   0x4 LB: > { %s583_s18 = sadd.s32 4294967295, %s808_s17   ;;  %s584_s19 = sadd.s32 4294967294, %s808_s17   ;;  %s808_s17 = sphi %s846_s17, %s16_s17   ;;  %s804_s16 = sphi %s844_s16, %s1060_s16   ;;  %s800_s15 = sphi %s842_s15, %s1059_s15   ;;  %s796_s14 = sphi %s840_s14, %s1058_s14   ;;  %s792_s13 = sphi %s838_s13, %s1057_s13   ;;  %s788_s12 = sphi %s836_s12, %s1056_s12  }
   0x5   : > { %s28_s20 = sadd.s32 1, %s804_s16  ;;  %s107_s21 = sadd.s32 1, %s796_s14 }
   0x6   : > { %p30_p0 = scmp.ge.s32.totalorder %s28_s20, 2  ;;  %p117_p1 = scmp.ne.s32.totalorder %s796_s14, %s792_s13 }
   0x7   : > { %p118_p2 = scmp.eq.s32.totalorder %s583_s18, 1  ;;  %p123_p3 = scmp.ne.s32.totalorder %s792_s13, %s788_s12 }
   0x8   : > { %s1062_s20 = smov (%p30_p0, %s28_s20), 0  ;;  %p124_p5 = scmp.eq.s32.totalorder %s584_s19, 1 }
   0x9   : > { %p876_p4 = por %p118_p2, %p117_p1  ;;  %s102_s23 = ssub.s32 %s804_s16, %s1062_s20 }
   0xa   : > { %p587_p6 = scmp.ge.s32.totalorder %s808_s17, 1  ;;  %p105_p7 = scmp.eq.s32.totalorder %s102_s23, 0 }
   0xb   : > { %p883_p8 = por %p124_p5, %p123_p3  ;;  %p161_p9 = scmp.lt.s32.totalorder %s808_s17, 3 }
   0xc   : > { %s889_s25 = scalar_select %p105_p7, %s796_s14, %s107_s21  }
   0xd   : > { %p162_p10 = pnand %p587_p6, %p161_p9 }
   0xe   : > { %p190_p11 = scmp.lt.s32.totalorder (!%p162_p10), %s800_s15, 1  ;;  %s186_s30 = sand.u32 (!%p162_p10), 1, %s792_s13  }
   0xf   : > { %165 = sbr.rel (%p162_p10) target bundleno = 200 (0xc8), region = 32  ;;  %s487_s11 = scalar_lea.sflag (!%p162_p10), [#allocation3], %s186_s30 }
  0x10   : > { %s983_s4 = smul.u32 (!%p162_p10), 80, %s186_s30 }
  0x11   : > { %s606_s5 = smul.u32 (!%p162_p10), 80, %s800_s15 }
  0x12   : > { %s992_s6 = scalar_lea.vmem (!%p162_p10), [#allocation2], %s983_s4 }
  0x13   : > { %s500_s8 = scalar_lea.hbm (!%p162_p10), %s1053_s3, %s606_s5  ;;  %s501_s9 = sshll.u32 (!%p162_p10), %s992_s6, 4  ;;  %s502_s9 = int_to_ptr.vmem [resolvable:$true] %s501_s9 }
  0x14   : > { %v205_v0 = vld [vmem:[%s1051_s1 + $0x10] sm:$0xf]  ;;  %v604_v1 = vld [vmem:[%s1051_s1 + $0x8] sm:$0xff]   ;;  %v597_v2 = vld [vmem:[%s1051_s1] sm:$0xff]   ;;  %v810_v3 = vmov 0   ;;  %v811_v5 = vmov 1  }
  0x15   : > { %674 = vset.pattern.permute.xlu1 %v810_v3  ;;  %v211_v4 = vunpack.c.l.bf16 %v205_v0  ;;  %681 = vset.pattern.permute.xlu2 %v811_v5  ;;  %v602_v6 = vunpack.c.l.bf16 %v604_v1  ;;  %v603_v7 = vunpack.c.h.bf16 %v604_v1  ;;  %v598_v8 = vunpack.c.l.bf16 %v597_v2  ;;  %v392_v15 = vld [vmem:[%s1052_s2] sm:$0xff]  ;;  %v395_v17 = vld [vmem:[%s1052_s2 + $0x18] sm:$0xff]  ;;  %v394_v18 = vld [vmem:[%s1052_s2 + $0x10] sm:$0xff]  ;;  %s191_s23 = scalar_select %p190_p11, %s800_s15, 1 }
  0x16   : > { %668 = vset.pattern.permute.xlu0 %v810_v3  ;;  %v599_v9 = vunpack.c.h.bf16 %v597_v2  ;;  %v812_v12 = vmov 2   ;;  %v813_v14 = vmov 3   ;;  %v396_v19 = vld [vmem:[%s1052_s2 + $0x20] sm:$0xff]  ;;  %v393_v20 = vld [vmem:[%s1052_s2 + $0x8] sm:$0xff]  ;;  %s503_s10 = sshll.u32 %s500_s8, 4  ;;  %s504_s10 = int_to_ptr.hbm [resolvable:$true] %s503_s10 }
  0x17   : > { %234 = vperm.xlu1 %674, %v211_v4   ;;  %v682_v10 = vpack.i.bf16 %v603_v7, %v602_v6  ;;  %v703_v13 = vpack.i.bf16 %v211_v4, %v603_v7  ;;  %s595_s26 = sshll.u32 %s191_s23, 2  ;;  %s744_s18 = sshra.s32 %s504_s10, 4  ;;  %s745_s18 = int_to_ptr.hbm [resolvable:$true] %s744_s18 }
  0x18   : > { %v669_v11 = vpack.i.bf16 %v599_v9, %v598_v8  ;;  %v715_v16 = vpack.i.bf16 %v602_v6, %v599_v9  ;;  %s197_s29 = scalar_lea.vmem %s1050_s0, %s595_s26  ;;  %s746_s19 = scalar_lea.hbm %s745_s18, 80 }
  0x19   : > { %683 = vperm.xlu2 %681, %v682_v10   ;;  %v200_v22 = vld [vmem:[%s197_s29] sm:$0xf]  ;;  %p747_p12 = scmp.ne.s32.totalorder %s745_s18, %s746_s19  ;;  %s750_s26 = scalar_lea.hbm %s1053_s3, 160 }
  0x1a   : > { %670 = vperm.xlu0 %668, %v669_v11   ;;  %v206_v24 = vunpack.c.l.bf16 %v200_v22  ;;  %p751_p1 = scmp.lt.s32.totalorder %s745_s18, %s1053_s3  ;;  %p752_p2 = scmp.lt.s32.totalorder %s750_s26, %s746_s19 }
  0x1b   : > { %p748_p13 = pnand %p747_p12, %p876_p4 }
  0x1c   : > { %v274_v26 = vperm.slane %v206_v24, 1  ;;  %v238_v28 = vperm.slane %v206_v24, 0  ;;  %v275_v29 = vperm.slane %v206_v24, 5  ;;  %v239_v30 = vperm.slane %v206_v24, 4  ;;  %p753_p3 = por %p752_p2, %p751_p1 }
  0x1d   : > { %v320_v38 = vperm.slane %v206_v24, 2  ;;  %v321_v39 = vperm.slane %v206_v24, 6  ;;  %v366_v41 = vperm.slane %v206_v24, 3  ;;  %v367_v42 = vperm.slane %v206_v24, 7  ;;  %p749_p0 = pneg %p748_p13 }
  0x1e   : > { %v278_v34 = vperm.slane %v274_v26, 1  ;;  %v922_v35 = vperm.slane %v238_v28, 0  ;;  %v279_v36 = vperm.slane %v275_v29, 1  ;;  %v924_v37 = vperm.slane %v239_v30, 0 }
  0x1f   : > { %675 = vset.pattern.permute.xlu1 %v811_v5  ;;  %v931_v48 = vperm.slane %v320_v38, 2  ;;  %v933_v49 = vperm.slane %v321_v39, 2  ;;  %v935_v51 = vperm.slane %v366_v41, 3  ;;  %v937_v52 = vperm.slane %v367_v42, 3  ;;  %p754_p5 = pnand %p753_p3, %p749_p0 }
  0x20   : > { %677 = vperm.xlu1 %675, %v669_v11  }
  0x21   : > { %271 = vperm.xlu2 %681, %v211_v4  }
  0x22   : > { %687 = vset.pattern.permute.xlu0 %v812_v12 }
  0x23   : > { %689 = vperm.xlu0 %687, %v669_v11  }
  0x28   : > { %693 = vset.pattern.permute.xlu1 %v812_v12 }
  0x29   : > { %699 = vset.pattern.permute.xlu2 %v813_v14  ;;  %695 = vperm.xlu1 %693, %v682_v10  }
  0x2a   : > { %347 = vperm.xlu2 %699, %v598_v8  }
  0x2b   : > { %702 = vset.pattern.permute.xlu0 %v813_v14 }
  0x2c   : > { %704 = vperm.xlu0 %702, %v703_v13  }
  0x31   : > { %700 = vset.pattern.permute.xlu1 %v810_v3 }
  0x32   : > { %701 = vset.pattern.permute.xlu2 %v812_v12  ;;  %399 = vperm.xlu1 %700, %v392_v15  }
  0x33   : > { %317 = vperm.xlu2 %701, %v211_v4  }
  0x34   : > { %708 = vset.pattern.permute.xlu0 %v810_v3 }
  0x35   : > { %710 = vperm.xlu0 %708, %v682_v10  }
  0x3a   : > { %714 = vset.pattern.permute.xlu1 %v813_v14 }
  0x3b   : > { %716 = vperm.xlu1 %714, %v715_v16   ;;  %720 = vset.pattern.permute.xlu2 %v810_v3 }
  0x3c   : > { %414 = vperm.xlu2 %720, %v395_v17  }
  0x3d   : > { %409 = vperm.xlu0 %708, %v394_v18  }
  0x43   : > { %721 = vset.pattern.permute.xlu1 %v810_v3 }
  0x44   : > { %419 = vperm.xlu1 %721, %v396_v19   ;;  %404 = vperm.xlu2 %720, %v393_v20  }
  0x73   : > { %v917_v21 = vpop.permute.xlu2 %683 }
  0x74   : > { %v686_v63 = vunpack.i.h.bf16 %v917_v21  ;;  %v685_v0 = vunpack.i.l.bf16 %v917_v21 }
  0x76   : > { %v284_v9 = vmul.f32 %v685_v0, %v278_v34  ;;  %v285_v10 = vmul.f32 %v685_v0, %v279_v36  ;;  %v286_v11 = vmul.f32 %v686_v63, %v278_v34  ;;  %v287_v18 = vmul.f32 %v686_v63, %v279_v36 }
  0x7b   : > { %v272_v27 = vpop.permute.xlu2 %271 }
  0x7c   : > { %v288_v3 = vmul.f32 %v278_v34, %v272_v27  ;;  %v289_v5 = vmul.f32 %v279_v36, %v272_v27 }
  0x84   : > { %v348_v50 = vpop.permute.xlu2 %347 }
  0x85   : > { %v372_v59 = vmul.f32 %v935_v51, %v348_v50  ;;  %v373_v60 = vmul.f32 %v937_v52, %v348_v50 }
  0x89   : > { %v235_v23 = vpop.permute.xlu1 %234 }
  0x8a   : > { %v252_v4 = vmul.f32 %v922_v35, %v235_v23  ;;  %v253_v6 = vmul.f32 %v924_v37, %v235_v23 }
  0x8c   : > { %v671_v25 = vpop.permute.xlu0 %670  ;;  %v298_v19 = vadd.f32 %v288_v3, %v252_v4  ;;  %v299_v22 = vadd.f32 %v289_v5, %v253_v6 }
  0x8d   : > { %v672_v31 = vunpack.i.l.bf16 %v671_v25  ;;  %v673_v1 = vunpack.i.h.bf16 %v671_v25  ;;  %v318_v12 = vpop.permute.xlu2 %317 }
  0x8f   : > { %v244_v43 = vmul.f32 %v672_v31, %v922_v35  ;;  %v245_v44 = vmul.f32 %v672_v31, %v924_v37  ;;  %v246_v14 = vmul.f32 %v673_v1, %v922_v35  ;;  %v247_v20 = vmul.f32 %v673_v1, %v924_v37 }
  0x90   : > { %v334_v31 = vmul.f32 %v931_v48, %v318_v12 }
  0x92   : > { %v678_v32 = vpop.permute.xlu1 %677 }
  0x93   : > { %v679_v33 = vunpack.i.l.bf16 %v678_v32  ;;  %v680_v2 = vunpack.i.h.bf16 %v678_v32  ;;  %v335_v32 = vmul.f32 %v933_v49, %v318_v12 }
  0x95   : > { %v926_v40 = vpop.permute.xlu0 %689  ;;  %v280_v45 = vmul.f32 %v679_v33, %v278_v34  ;;  %v281_v46 = vmul.f32 %v679_v33, %v279_v36  ;;  %v282_v15 = vmul.f32 %v680_v2, %v278_v34  ;;  %v283_v21 = vmul.f32 %v680_v2, %v279_v36 }
  0x96   : > { %v691_v47 = vunpack.i.l.bf16 %v926_v40  ;;  %v692_v23 = vunpack.i.h.bf16 %v926_v40 }
  0x97   : > { %v290_v53 = vadd.f32 %v280_v45, %v244_v43  ;;  %v291_v54 = vadd.f32 %v281_v46, %v245_v44  ;;  %v292_v33 = vadd.f32 %v282_v15, %v246_v14  ;;  %v293_v34 = vadd.f32 %v283_v21, %v247_v20 }
  0x98   : > { %v326_v55 = vmul.f32 %v691_v47, %v931_v48  ;;  %v327_v56 = vmul.f32 %v691_v47, %v933_v49  ;;  %v328_v39 = vmul.f32 %v692_v23, %v931_v48  ;;  %v415_v47 = vpop.permute.xlu2 %414  ;;  %v329_v50 = vmul.f32 %v692_v23, %v933_v49 }
  0x9a   : > { %v336_v61 = vadd.f32 %v326_v55, %v290_v53  ;;  %v337_v62 = vadd.f32 %v327_v56, %v291_v54 }
  0x9b   : > { %v941_v57 = vpop.permute.xlu1 %695 }
  0x9c   : > { %v382_v7 = vadd.f32 %v372_v59, %v336_v61  ;;  %v383_v8 = vadd.f32 %v373_v60, %v337_v62  ;;  %v698_v27 = vunpack.i.h.bf16 %v941_v57  ;;  %v697_v36 = vunpack.i.l.bf16 %v941_v57 }
  0x9e   : > { %v943_v58 = vpop.permute.xlu0 %704  ;;  %v332_v43 = vmul.f32 %v698_v27, %v931_v48  ;;  %v333_v53 = vmul.f32 %v698_v27, %v933_v49  ;;  %v330_v56 = vmul.f32 %v697_v36, %v931_v48 }
  0x9f   : > { %v706_v28 = vunpack.i.l.bf16 %v943_v58  ;;  %v707_v44 = vunpack.i.h.bf16 %v943_v58  ;;  %v331_v58 = vmul.f32 %v697_v36, %v933_v49  ;;  %v344_v49 = vadd.f32 %v334_v31, %v298_v19 }
  0xa1   : > { %v378_v45 = vmul.f32 %v706_v28, %v935_v51  ;;  %v379_v54 = vmul.f32 %v706_v28, %v937_v52  ;;  %v380_v1 = vmul.f32 %v707_v44, %v935_v51  ;;  %v381_v2 = vmul.f32 %v707_v44, %v937_v52 }
  0xa3   : > { %v390_v20 = vadd.f32 %v380_v1, %v344_v49 }
  0xa4   : > { %v400_v13 = vpop.permute.xlu1 %399 }
  0xa5   : > { %v422_v16 = vadd.f32 %v400_v13, %v382_v7  ;;  %v423_v17 = vadd.f32 %v400_v13, %v383_v8 }
  0xa7   : > { %v590_v24 = vmul.f32 -1.442695, %v422_v16  ;;  %v591_v25 = vmul.f32 -1.442695, %v423_v17  ;;  %v711_v26 = vpop.permute.xlu0 %710  ;;  %v338_v16 = vadd.f32 %v328_v39, %v292_v33  ;;  %v339_v17 = vadd.f32 %v329_v50, %v293_v34 }
  0xa8   : > { %v713_v29 = vunpack.i.h.bf16 %v711_v26  ;;  %v712_v30 = vunpack.i.l.bf16 %v711_v26 }
  0xa9   : > { %722 = vpow2.f32 %v590_v24  ;;  %v405_v24 = vpop.permute.xlu2 %404 }
  0xaa   : > { %724 = vpow2.f32 %v591_v25  ;;  %v250_v38 = vmul.f32 %v713_v29, %v922_v35  ;;  %v248_v40 = vmul.f32 %v712_v30, %v922_v35  ;;  %v249_v41 = vmul.f32 %v712_v30, %v924_v37 }
  0xab   : > { %v251_v42 = vmul.f32 %v713_v29, %v924_v37 }
  0xac   : > { %v296_v46 = vadd.f32 %v286_v11, %v250_v38  ;;  %v294_v61 = vadd.f32 %v284_v9, %v248_v40  ;;  %v295_v62 = vadd.f32 %v285_v10, %v249_v41  ;;  %v345_v10 = vadd.f32 %v335_v32, %v299_v22 }
  0xad   : > { %v297_v35 = vadd.f32 %v287_v18, %v251_v42  ;;  %v717_v55 = vpop.permute.xlu1 %716 }
  0xae   : > { %v342_v37 = vadd.f32 %v332_v43, %v296_v46  ;;  %v719_v57 = vunpack.i.h.bf16 %v717_v55  ;;  %v718_v59 = vunpack.i.l.bf16 %v717_v55  ;;  %v340_v11 = vadd.f32 %v330_v56, %v294_v61 }
  0xaf   : > { %v723_v60 = vpop.eup %722  ;;  %v343_v63 = vadd.f32 %v333_v53, %v297_v35  ;;  %v341_v12 = vadd.f32 %v331_v58, %v295_v62  ;;  %v410_v15 = vpop.permute.xlu0 %409  ;;  %v391_v21 = vadd.f32 %v381_v2, %v345_v10 }
  0xb0   : > { %v725_v0 = vpop.eup %724  ;;  %v975_v3 = vadd.f32 1.0, %v723_v60  ;;  %v388_v4 = vadd.f32 %v378_v45, %v342_v37  ;;  %v376_v6 = vmul.f32 %v719_v57, %v935_v51  ;;  %v377_v7 = vmul.f32 %v719_v57, %v937_v52 }
  0xb1   : > { %v977_v48 = vadd.f32 1.0, %v725_v0  ;;  %v389_v5 = vadd.f32 %v379_v54, %v343_v63  ;;  %v374_v8 = vmul.f32 %v718_v59, %v935_v51  ;;  %v375_v9 = vmul.f32 %v718_v59, %v937_v52 }
  0xb2   : > { %726 = vrcp.f32 %v975_v3  ;;  %v428_v13 = vadd.f32 %v415_v47, %v388_v4  ;;  %v386_v18 = vadd.f32 %v376_v6, %v340_v11  ;;  %v387_v19 = vadd.f32 %v377_v7, %v341_v12 }
  0xb3   : > { %728 = vrcp.f32 %v977_v48  ;;  %v429_v14 = vadd.f32 %v415_v47, %v389_v5  ;;  %v384_v52 = vadd.f32 %v374_v8, %v338_v16  ;;  %v385_v22 = vadd.f32 %v375_v9, %v339_v17 }
  0xb4   : > { %v470_v23 = vmax.f32 %v428_v13, -3.0  ;;  %v426_v26 = vadd.f32 %v410_v15, %v386_v18  ;;  %v427_v31 = vadd.f32 %v410_v15, %v387_v19  ;;  %v451_v42 = vand.u32 2147483648, %v975_v3 }
  0xb5   : > { %v471_v51 = vmax.f32 %v429_v14, -3.0  ;;  %v424_v36 = vadd.f32 %v405_v24, %v384_v52  ;;  %v425_v39 = vadd.f32 %v405_v24, %v385_v22  ;;  %v449_v46 = vand.u32 2147483647, %v975_v3 }
  0xb6   : > { %v420_v25 = vpop.permute.xlu1 %419  ;;  %v472_v29 = vmin.f32 %v470_v23, 5.0  ;;  %480 = vst [vmem:[%s992_s6 + $0x20] sm:$0xff] %v426_v26  ;;  %v466_v47 = vand.u32 2147483648, %v977_v48  ;;  %v464_v53 = vand.u32 2147483647, %v977_v48  ;;  %vm445_vm2 = vweird.f32 %v975_v3 }
  0xb7   : > { %v430_v27 = vadd.f32 %v420_v25, %v390_v20  ;;  %v473_v30 = vmin.f32 %v471_v51, 5.0  ;;  %v431_v32 = vadd.f32 %v420_v25, %v391_v21  ;;  %481 = vst [vmem:[%s992_s6 + $0x28] sm:$0xff] %v427_v31  ;;  %v452_v35 = vor.u32 1.1754944e-38, %v451_v42 }
  0xb8   : > { %v727_v28 = vpop.eup %726  ;;  %482 = vst [vmem:[%s992_s6 + $0x30] sm:$0xff] %v472_v29  ;;  %vm460_vm4 = vweird.f32 %v977_v48  ;;  %vm450_vm5 = vcmp.eq.f32.partialorder %v449_v46, 8.507059e+37  ;;  %v467_v37 = vor.u32 1.1754944e-38, %v466_v47  ;;  %vm465_vm7 = vcmp.eq.f32.partialorder %v464_v53, 8.507059e+37 }
  0xb9   : > { %v729_v33 = vpop.eup %728  ;;  %v441_v34 = vmul.f32 %v727_v28, %v975_v3  ;;  %483 = vst [vmem:[%s992_s6 + $0x38] sm:$0xff] %v473_v30  ;;  %v474_v41 = vmax.f32 %v430_v27, 0.0  ;;  %v475_v44 = vmax.f32 %v431_v32, 0.0  ;;  %vm446_vm0 = vweird.f32 %v727_v28 }
  0xba   : > { %v456_v38 = vmul.f32 %v729_v33, %v977_v48  ;;  %478 = vst [vmem:[%s992_s6 + $0x10] sm:$0xff] %v424_v36  ;;  %vm461_vm1 = vweird.f32 %v729_v33  ;;  %vm447_vm3 = vmor %vm445_vm2, %vm446_vm0 }
  0xbb   : > { %v442_v40 = vsub.f32 1.0, %v441_v34  ;;  %479 = vst [vmem:[%s992_s6 + $0x18] sm:$0xff] %v425_v39  ;;  %vm462_vm6 = vmor %vm460_vm4, %vm461_vm1 }
  0xbc   : > { %v457_v43 = vsub.f32 1.0, %v456_v38  ;;  %484 = vst [vmem:[%s992_s6 + $0x40] sm:$0xff] %v474_v41 }
  0xbd   : > { %v443_v45 = vmul.f32 %v727_v28, %v442_v40  ;;  %485 = vst [vmem:[%s992_s6 + $0x48] sm:$0xff] %v475_v44 }
  0xbe   : > { %v458_v50 = vmul.f32 %v729_v33, %v457_v43 }
  0xbf   : > { %v444_v54 = vadd.f32 %v727_v28, %v443_v45 }
  0xc0   : > { %v459_v55 = vadd.f32 %v729_v33, %v458_v50 }
  0xc1   : > { %v448_v56 = vsel %vm447_vm3, %v727_v28, %v444_v54 }
  0xc2   : > { %v453_v57 = vsel %vm450_vm5, %v452_v35, %v448_v56  ;;  %v463_v59 = vsel %vm462_vm6, %v729_v33, %v459_v55 }
  0xc3   : > { %v468_v60 = vsel %vm465_vm7, %v467_v37, %v463_v59  ;;  %476 = vst [vmem:[%s992_s6] sm:$0xff] %v453_v57 }
  0xc4   : > { %477 = vst [vmem:[%s992_s6 + $0x8] sm:$0xff] %v468_v60 }
  0xc5   : > { %757 = shalt.err (!%p754_p5)
}
  0xc6   : > { %s814_s29 = smov 256   ;;  %s815_s30 = smov 16  }
  0xc7   : > { %607 = dma.vmem_to_hbm [thread:$0]  (%p876_p4), %s502_s9, 1280, %s504_s10, %s487_s11, %s814_s29, %s814_s29, %s815_s30  }
  0xc8 PF: > { %p613_p6 = scmp.ge.s32.totalorder %s808_s17, 2  ;;  %s518_s4 = sand.u32 1, %s788_s12  }
  0xc9   : > { %s519_s5 = scalar_lea.sflag [#allocation3], %s518_s4 }
  0xca   : > { %p610_p7 = pnand %p613_p6, %p883_p8 }
  0xcc   : > { %p611_p9 = pneg %p610_p7 }
  0xce   : > { %783 = dma.done.wait (%p611_p9), %s519_s5, 1280  }
  0xcf   : > { %785 = vsyncadd (%p611_p9), %s519_s5, 4294966016  ;;  %s16_s17 = sadd.s32 1, %s808_s17   ;;  %s1056_s12 = smov %s792_s13 }
  0xd0   : > { %p13_p10 = scmp.ge.s32.totalorder %s16_s17, 4   ;;  %s1057_s13 = smov %s796_s14 }
  0xd1   : > { %s1058_s14 = smov %s889_s25  ;;  %s1059_s15 = smov %s804_s16 }
  0xd2   : > { %s1060_s16 = smov %s1062_s20  ;;  %15 = sbr.rel (!%p13_p10) target bundleno = 4 (0x4), region = 67 }
  0xd7   :  { %525 = vsyncpa [#allocation3], 1 }
  0xd8   :  { %527 = vsyncpa [#allocation3 + $0x1], 1 }

</bundles_post_ra>
